<compile_context>
chip_gen: v5e
topology: v5e:2x2
jax: 0.10.0
libtpu: 0.0.40
codegen_flags: <defaults>
</compile_context>

<pallas_src>
import functools
import math

import jax
import jax.numpy as jnp
from jax.experimental import pallas as pl
from jax.experimental.pallas import tpu as pltpu


# ------------------------------------------------------------------
# Parameter ("buffer") setup — same math as the torch module __init__.
# ------------------------------------------------------------------
def make_rope_tables(max_position: int, embedding_size: int):
    """Returns (cos_position, sin_position), each [max_position, embedding_size]."""
    position = jnp.arange(max_position, dtype=jnp.float32)[:, None]           # [P, 1]
    div_term = jnp.exp(
        jnp.arange(0, embedding_size, 2, dtype=jnp.float32)
        * (-math.log(10000.0) / embedding_size)
    )                                                                          # [D/2]
    angles = position * div_term                                               # [P, D/2]
    # torch: cos_position = table[:, 1::2].repeat_interleave(2) == repeat(cos(angles), 2)
    #        sin_position = table[:, 0::2].repeat_interleave(2) == repeat(sin(angles), 2)
    cos_position = jnp.repeat(jnp.cos(angles), 2, axis=-1)                     # [P, D]
    sin_position = jnp.repeat(jnp.sin(angles), 2, axis=-1)                     # [P, D]
    return cos_position, sin_position


# ------------------------------------------------------------------
# Pallas kernel: RoPE rotation on a flattened (TS, H*D) tile.
#   out[p] = x[p]*cos[p%D] + x[p+1]*sin_next[p%D] + x[p-1]*sin_prev[p%D]
# where sin_next is (-sin) on even lanes / 0 on odd, sin_prev is (+sin) on odd
# lanes / 0 on even — parity and sign baked into the tables by the wrapper.
# ------------------------------------------------------------------
def rope_kernel(q_ref, cos_ref, sinn_ref, sinp_ref, o_ref):
    n_heads = o_ref.shape[0]
    head_dim = o_ref.shape[2]
    hd = q_ref.shape[-1]                                   # == n_heads * head_dim

    x = q_ref[...].astype(jnp.float32)                     # (TS, H*D), f32 compute

    def tile_heads(t):                                     # (TS, D) -> (TS, H*D)
        return t if n_heads == 1 else jnp.concatenate([t] * n_heads, axis=-1)

    cos = tile_heads(cos_ref[...])                         # f32
    sin_next = tile_heads(sinn_ref[...])                   # -sin on even lanes, else 0
    sin_prev = tile_heads(sinp_ref[...])                   # +sin on odd lanes, else 0

    # pltpu.roll requires non-negative shift: shift=hd-1 == shift by -1.
    x_next = pltpu.roll(x, shift=hd - 1, axis=1)           # pos p <- x[(p+1) % hd]
    x_prev = pltpu.roll(x, shift=1, axis=1)                # pos p <- x[(p-1) % hd]

    y = x * cos + x_next * sin_next + x_prev * sin_prev    # (TS, H*D) f32

    # Store per head: each o_ref[h] slab is a contiguous (TS, D) chunk of the
    # [B, H, S, D] output, so the writeback DMA stays contiguous.
    for h in range(n_heads):                               # static unroll
        o_ref[h] = y[:, h * head_dim:(h + 1) * head_dim].astype(o_ref.dtype)


# ------------------------------------------------------------------
# Tile selection: largest seq tile whose (TS, H*D) f32 working block fits the
# per-block budget.  Prefers a multiple-of-sublane divisor of S; falls back to
# a whole-S block (always layout-legal) only if it fits the budget; otherwise a
# cdiv grid with a Pallas-masked ragged tail.
# ------------------------------------------------------------------
def _pick_seq_tile(S: int, flat_width: int, sublane: int, block_budget_bytes: int) -> int:
    cap = max(sublane, block_budget_bytes // max(1, flat_width * 4))
    max_ts = min(cap, S)
    best = 0
    ts = sublane
    while ts <= max_ts:
        if S % ts == 0:
            best = ts
        ts += sublane
    if best:
        return best
    if S <= cap:
        return S                               # full-dim block, always legal
    return (max_ts // sublane) * sublane       # ragged tail, masked by Pallas


# ------------------------------------------------------------------
# Wrapper.
# ------------------------------------------------------------------
@functools.partial(jax.jit, static_argnames=("seq_tile",))
def rope_position_encoding(qw, cos_position, sin_position, seq_tile=None):
    """qw: [B, S, H, D].  Returns [B, H, S, D] (same as the torch module)."""
    B, S, H, D = qw.shape
    assert D % 2 == 0, "RoPE requires an even head dim"
    assert S <= cos_position.shape[0], "sequence longer than max_position"
    HD = H * D

    itemsize = jnp.dtype(qw.dtype).itemsize
    sublane = {4: 8, 2: 16, 1: 32}.get(itemsize, 8)

    # Generation-aware budgets (v5e/v6e: 128 MiB physical VMEM; v7x: 64 MiB).
    try:
        vmem_cap = int(pltpu.get_tpu_info().vmem_capacity_bytes)
    except Exception:
        vmem_cap = 64 * 1024 * 1024
    if vmem_cap >= 100 * 1024 * 1024:
        block_budget = 4 * 1024 * 1024
        vmem_limit = 96 * 1024 * 1024
    else:
        block_budget = 2 * 1024 * 1024
        vmem_limit = 48 * 1024 * 1024

    TS = seq_tile if seq_tile is not None else _pick_seq_tile(S, HD, sublane, block_budget)
    n_s = (S + TS - 1) // TS

    # Tables stay f32 and [S, D] in HBM (tiny traffic, fetched once per seq tile).
    even = (jnp.arange(D) % 2) == 0
    cos_f = cos_position[:S].astype(jnp.float32)
    sin_f = sin_position[:S].astype(jnp.float32)
    sin_next_tab = jnp.where(even, -sin_f, 0.0).astype(jnp.float32)   # pairs with x[p+1]
    sin_prev_tab = jnp.where(even, 0.0, sin_f).astype(jnp.float32)    # pairs with x[p-1]

    # Free reshape: collapses the contiguous trailing (H, D) dims so each input
    # block DMA is a single contiguous (TS, H*D) slab.
    qw_flat = qw.reshape(B, S, HD)

    # Grid: (seq tiles, batch) — seq outermost so cos/sin block index is
    # unchanged across the batch inner loop and their re-DMA is skipped.
    grid = (n_s, B)

    out = pl.pallas_call(
        rope_kernel,
        out_shape=jax.ShapeDtypeStruct((B, H, S, D), qw.dtype),
        grid=grid,
        in_specs=[
            pl.BlockSpec((pl.Squeezed(), TS, HD), lambda s, b: (b, s, 0)),
            pl.BlockSpec((TS, D), lambda s, b: (s, 0)),
            pl.BlockSpec((TS, D), lambda s, b: (s, 0)),
            pl.BlockSpec((TS, D), lambda s, b: (s, 0)),
        ],
        out_specs=pl.BlockSpec((pl.Squeezed(), H, TS, D), lambda s, b: (b, 0, s, 0)),
        compiler_params=pltpu.CompilerParams(
            dimension_semantics=("parallel", "parallel"),
            vmem_limit_bytes=vmem_limit,
        ),
    )(qw_flat, cos_f, sin_next_tab, sin_prev_tab)
    return out


# ------------------------------------------------------------------
# Pure-JAX reference (mirrors the torch forward exactly) for validation.
# ------------------------------------------------------------------
def rope_reference(qw, cos_position, sin_position):
    S = qw.shape[1]
    q = jnp.transpose(qw, (0, 2, 1, 3))             # [B, H, S, D]
    q_even = q[..., 0::2]
    q_odd = q[..., 1::2]
    q2 = jnp.stack([-q_odd, q_even], axis=-1).reshape(q.shape)
    return q * cos_position[:S] + q2 * sin_position[:S]


if __name__ == "__main__":
    B, S, H, D = 2, 8, 4, 32
    max_position = 16

    key = jax.random.PRNGKey(0)
    qw = jax.random.normal(key, (B, S, H, D), dtype=jnp.float32)

    cos_position, sin_position = make_rope_tables(max_position, D)

    out = rope_position_encoding(qw, cos_position, sin_position)
    out = jax.block_until_ready(out)

    ref = rope_reference(qw, cos_position, sin_position)
    assert out.shape == (B, H, S, D)
    assert jnp.allclose(out, ref, atol=1e-5, rtol=1e-5), "mismatch vs reference"

    print("KERNEL_OK")
</pallas_src>

<mosaic_0001>
module attributes {stable_mosaic.version = 11 : i64} {
  func.func @rope_kernel(%arg0: i32, %arg1: i32, %arg2: memref<1x8x128xf32, #tpu.memory_space<vmem>>, %arg3: memref<8x32xf32, #tpu.memory_space<vmem>>, %arg4: memref<8x32xf32, #tpu.memory_space<vmem>>, %arg5: memref<8x32xf32, #tpu.memory_space<vmem>>, %arg6: memref<1x4x8x32xf32, #tpu.memory_space<vmem>>) attributes {dimension_semantics = [#tpu.dimension_semantics<parallel>, #tpu.dimension_semantics<parallel>], iteration_bounds = array<i64: 1, 2>, scalar_prefetch = 0 : i64, scratch_operands = 0 : i64, tpu.core_type = #tpu.core_type<tc>, window_params = [{transform_indices = @transform_0, window_bounds = array<i64: 1, 8, 128>}, {transform_indices = @transform_1, window_bounds = array<i64: 8, 32>}, {transform_indices = @transform_2, window_bounds = array<i64: 8, 32>}, {transform_indices = @transform_3, window_bounds = array<i64: 8, 32>}, {transform_indices = @transform_4, window_bounds = array<i64: 1, 4, 8, 32>}]} {
    %c0 = arith.constant 0 : index
    %c0_0 = arith.constant 0 : index
    %c0_1 = arith.constant 0 : index
    %0 = vector.load %arg2[%c0, %c0_0, %c0_1] : memref<1x8x128xf32, #tpu.memory_space<vmem>>, vector<1x8x128xf32>
    %1 = vector.shape_cast %0 : vector<1x8x128xf32> to vector<8x128xf32>
    %c0_2 = arith.constant 0 : index
    %c0_3 = arith.constant 0 : index
    %2 = vector.load %arg3[%c0_2, %c0_3] : memref<8x32xf32, #tpu.memory_space<vmem>>, vector<8x32xf32>
    %3 = tpu.concatenate %2, %2, %2, %2 in 1 : vector<8x32xf32>, vector<8x32xf32>, vector<8x32xf32>, vector<8x32xf32> -> vector<8x128xf32>
    %c0_4 = arith.constant 0 : index
    %c0_5 = arith.constant 0 : index
    %4 = vector.load %arg4[%c0_4, %c0_5] : memref<8x32xf32, #tpu.memory_space<vmem>>, vector<8x32xf32>
    %5 = tpu.concatenate %4, %4, %4, %4 in 1 : vector<8x32xf32>, vector<8x32xf32>, vector<8x32xf32>, vector<8x32xf32> -> vector<8x128xf32>
    %c0_6 = arith.constant 0 : index
    %c0_7 = arith.constant 0 : index
    %6 = vector.load %arg5[%c0_6, %c0_7] : memref<8x32xf32, #tpu.memory_space<vmem>>, vector<8x32xf32>
    %7 = tpu.concatenate %6, %6, %6, %6 in 1 : vector<8x32xf32>, vector<8x32xf32>, vector<8x32xf32>, vector<8x32xf32> -> vector<8x128xf32>
    %c127_i32 = arith.constant 127 : i32
    %8 = tpu.dynamic_rotate %1 by %c127_i32 dim 1 : vector<8x128xf32>, i32 -> vector<8x128xf32>
    %c1_i32 = arith.constant 1 : i32
    %9 = tpu.dynamic_rotate %1 by %c1_i32 dim 1 : vector<8x128xf32>, i32 -> vector<8x128xf32>
    %10 = arith.mulf %1, %3 : vector<8x128xf32>
    %11 = arith.mulf %8, %5 : vector<8x128xf32>
    %12 = arith.addf %10, %11 : vector<8x128xf32>
    %13 = arith.mulf %9, %7 : vector<8x128xf32>
    %14 = arith.addf %12, %13 : vector<8x128xf32>
    %15 = vector.extract_strided_slice %14 {offsets = [0, 0], sizes = [8, 32], strides = [1, 1]} : vector<8x128xf32> to vector<8x32xf32>
    %c0_8 = arith.constant 0 : index
    %c0_9 = arith.constant 0 : index
    %c0_10 = arith.constant 0 : index
    %c0_11 = arith.constant 0 : index
    %16 = vector.load %arg6[%c0_8, %c0_9, %c0_10, %c0_11] : memref<1x4x8x32xf32, #tpu.memory_space<vmem>>, vector<1x1x8x32xf32>
    %17 = vector.shape_cast %16 : vector<1x1x8x32xf32> to vector<8x32xf32>
    %18 = vector.shape_cast %15 : vector<8x32xf32> to vector<1x1x8x32xf32>
    tpu.vector_store %arg6[%c0_8, %c0_9, %c0_10, %c0_11], %18 {strides = array<i32>} : memref<1x4x8x32xf32, #tpu.memory_space<vmem>>, vector<1x1x8x32xf32>,
    %19 = vector.extract_strided_slice %14 {offsets = [0, 32], sizes = [8, 32], strides = [1, 1]} : vector<8x128xf32> to vector<8x32xf32>
    %c0_12 = arith.constant 0 : index
    %c1 = arith.constant 1 : index
    %c0_13 = arith.constant 0 : index
    %c0_14 = arith.constant 0 : index
    %20 = vector.load %arg6[%c0_12, %c1, %c0_13, %c0_14] : memref<1x4x8x32xf32, #tpu.memory_space<vmem>>, vector<1x1x8x32xf32>
    %21 = vector.shape_cast %20 : vector<1x1x8x32xf32> to vector<8x32xf32>
    %22 = vector.shape_cast %19 : vector<8x32xf32> to vector<1x1x8x32xf32>
    tpu.vector_store %arg6[%c0_12, %c1, %c0_13, %c0_14], %22 {strides = array<i32>} : memref<1x4x8x32xf32, #tpu.memory_space<vmem>>, vector<1x1x8x32xf32>,
    %23 = vector.extract_strided_slice %14 {offsets = [0, 64], sizes = [8, 32], strides = [1, 1]} : vector<8x128xf32> to vector<8x32xf32>
    %c0_15 = arith.constant 0 : index
    %c2 = arith.constant 2 : index
    %c0_16 = arith.constant 0 : index
    %c0_17 = arith.constant 0 : index
    %24 = vector.load %arg6[%c0_15, %c2, %c0_16, %c0_17] : memref<1x4x8x32xf32, #tpu.memory_space<vmem>>, vector<1x1x8x32xf32>
    %25 = vector.shape_cast %24 : vector<1x1x8x32xf32> to vector<8x32xf32>
    %26 = vector.shape_cast %23 : vector<8x32xf32> to vector<1x1x8x32xf32>
    tpu.vector_store %arg6[%c0_15, %c2, %c0_16, %c0_17], %26 {strides = array<i32>} : memref<1x4x8x32xf32, #tpu.memory_space<vmem>>, vector<1x1x8x32xf32>,
    %27 = vector.extract_strided_slice %14 {offsets = [0, 96], sizes = [8, 32], strides = [1, 1]} : vector<8x128xf32> to vector<8x32xf32>
    %c0_18 = arith.constant 0 : index
    %c3 = arith.constant 3 : index
    %c0_19 = arith.constant 0 : index
    %c0_20 = arith.constant 0 : index
    %28 = vector.load %arg6[%c0_18, %c3, %c0_19, %c0_20] : memref<1x4x8x32xf32, #tpu.memory_space<vmem>>, vector<1x1x8x32xf32>
    %29 = vector.shape_cast %28 : vector<1x1x8x32xf32> to vector<8x32xf32>
    %30 = vector.shape_cast %27 : vector<8x32xf32> to vector<1x1x8x32xf32>
    tpu.vector_store %arg6[%c0_18, %c3, %c0_19, %c0_20], %30 {strides = array<i32>} : memref<1x4x8x32xf32, #tpu.memory_space<vmem>>, vector<1x1x8x32xf32>,
    return
  }
  func.func @transform_0(%arg0: i32, %arg1: i32) -> (i32, i32, i32) {
    %c0_i32 = arith.constant 0 : i32
    %c0_i32_0 = arith.constant 0 : i32
    return %arg1, %arg0, %c0_i32 : i32, i32, i32
  }
  func.func @transform_1(%arg0: i32, %arg1: i32) -> (i32, i32) {
    %c0_i32 = arith.constant 0 : i32
    %c0_i32_0 = arith.constant 0 : i32
    return %arg0, %c0_i32 : i32, i32
  }
  func.func @transform_2(%arg0: i32, %arg1: i32) -> (i32, i32) {
    %c0_i32 = arith.constant 0 : i32
    %c0_i32_0 = arith.constant 0 : i32
    return %arg0, %c0_i32 : i32, i32
  }
  func.func @transform_3(%arg0: i32, %arg1: i32) -> (i32, i32) {
    %c0_i32 = arith.constant 0 : i32
    %c0_i32_0 = arith.constant 0 : i32
    return %arg0, %c0_i32 : i32, i32
  }
  func.func @transform_4(%arg0: i32, %arg1: i32) -> (i32, i32, i32, i32) {
    %c0_i32 = arith.constant 0 : i32
    %c0_i32_0 = arith.constant 0 : i32
    %c0_i32_1 = arith.constant 0 : i32
    return %arg1, %c0_i32, %arg0, %c0_i32_0 : i32, i32, i32, i32
  }
}

</mosaic_0001>

<bundles_post_ra>
// kernel: rope_position_encoding.1
= control target key start
LH: loop header
LB: loop body
LE: loop exit
PB: predicated region body
PF: predicated region fallthrough
CT: control target
= control target key end

     0   :  { %9 = vsyncpa [#allocation3], 0  ;;  %s796_s0 = inlined_call_operand.vmem [shape: f32[2,8,128], index: 0, kind: input, shape index: {}]   ;;  %s797_s1 = inlined_call_operand.vmem [shape: f32[8,32], index: 1, kind: input, shape index: {}]   ;;  %s798_s2 = inlined_call_operand.vmem [shape: f32[8,32], index: 2, kind: input, shape index: {}]   ;;  %s799_s3 = inlined_call_operand.vmem [shape: f32[8,32], index: 3, kind: input, shape index: {}]   ;;  %s800_s4 = inlined_call_operand.hbm [shape: f32[2,4,8,32], index: 4, kind: output, shape index: {}]  }
   0x1   :  { %11 = vsyncpa [#allocation3 + $0x1], 0  ;;  %s671_s15 = smov 0   ;;  %s673_s16 = smov 0  }
   0x2   :  { %s675_s17 = smov 0   ;;  %s677_s18 = smov 0  }
   0x3   :  { %s679_s19 = smov 0   ;;  %s681_s20 = smov 0  }
   0x4 LB: > { %s478_s21 = sadd.s32 4294967295, %s637_s20   ;;  %s479_s22 = sadd.s32 4294967294, %s637_s20   ;;  %s637_s20 = sphi %s681_s20, %s17_s20   ;;  %s633_s19 = sphi %s679_s19, %s807_s19   ;;  %s629_s18 = sphi %s677_s18, %s806_s18   ;;  %s625_s17 = sphi %s675_s17, %s805_s17   ;;  %s621_s16 = sphi %s673_s16, %s804_s16   ;;  %s617_s15 = sphi %s671_s15, %s803_s15  }
   0x5   : > { %s26_s23 = sadd.s32 1, %s633_s19  ;;  %s144_s24 = sadd.s32 1, %s625_s17 }
   0x6   : > { %p27_p0 = scmp.ge.s32.totalorder %s26_s23, 2  ;;  %p154_p1 = scmp.ne.s32.totalorder %s625_s17, %s621_s16 }
   0x7   : > { %p155_p2 = scmp.eq.s32.totalorder %s478_s21, 1  ;;  %p160_p3 = scmp.ne.s32.totalorder %s621_s16, %s617_s15 }
   0x8   : > { %s809_s23 = smov (%p27_p0, %s26_s23), 0  ;;  %p161_p5 = scmp.eq.s32.totalorder %s479_s22, 1 }
   0x9   : > { %p711_p4 = por %p155_p2, %p154_p1  ;;  %s139_s26 = ssub.s32 %s633_s19, %s809_s23 }
   0xa   : > { %p485_p6 = scmp.ge.s32.totalorder %s637_s20, 1  ;;  %p142_p7 = scmp.eq.s32.totalorder %s139_s26, 0 }
   0xb   : > { %p718_p8 = por %p161_p5, %p160_p3  ;;  %p210_p9 = scmp.lt.s32.totalorder %s637_s20, 3 }
   0xc   : > { %s724_s28 = scalar_select %p142_p7, %s625_s17, %s144_s24  }
   0xd   : > { %p211_p10 = pnand %p485_p6, %p210_p9 }
   0xe   : > { %s639_s5 = smov (!%p211_p10), 32   ;;  %s640_s6 = smov (!%p211_p10), 64  }
   0xf   : > { %214 = sbr.rel (%p211_p10) target bundleno = 285 (0x11d), region = 36  ;;  %s641_s7 = smov (!%p211_p10), 96  }
  0x10   : > { %p250_p11 = scmp.lt.s32.totalorder (!%p211_p10), %s629_s18, 1  ;;  %s642_s24 = smov (!%p211_p10), 127  }
  0x11   : > { %s643_s26 = smov (!%p211_p10), 1   ;;  %s247_s29 = sand.u32 (!%p211_p10), 1, %s621_s16  }
  0x12   : > { %s486_s30 = sshll.u32 (!%p211_p10), %s247_s29, 5  ;;  %s496_s9 = sshll.u32 (!%p211_p10), %s629_s18, 5 }
  0x13   : > { %s249_s8 = scalar_lea.vmem (!%p211_p10), [#allocation2], %s486_s30  ;;  %s354_s12 = scalar_lea.hbm (!%p211_p10), %s800_s4, %s496_s9 }
  0x14   : > { %v270_v0 = vld [vmem:[%s797_s1] sm:$0xff]  ;;  %s251_s10 = scalar_select %p250_p11, %s629_s18, 1  ;;  %vm281_vm0 = vcmask 261120   ;;  %vm283_vm1 = vcmask 523264   ;;  %vm285_vm2 = vcmask 785408  }
  0x15   : > { %272 = vrot.lane.b32.xlu0 %v270_v0, %s639_s5  ;;  %275 = vrot.lane.b32.xlu1 %v270_v0, %s640_s6  ;;  %v287_v1 = vld [vmem:[%s798_s2] sm:$0xff]  ;;  %s355_s13 = sshll.u32 %s249_s8, 4  ;;  %s357_s14 = sshll.u32 %s354_s12, 4  ;;  %s356_s13 = int_to_ptr.vmem [resolvable:$true] %s355_s13  ;;  %s358_s14 = int_to_ptr.hbm [resolvable:$true] %s357_s14 }
  0x16   : > { %278 = vrot.lane.b32.xlu2 %v270_v0, %s641_s7  ;;  %s487_s11 = sshll.u32 %s251_s10, 3  ;;  %v301_v2 = vld [vmem:[%s799_s3] sm:$0xff] }
  0x17   : > { %s256_s22 = scalar_lea.vmem %s796_s0, %s487_s11 }
  0x18   : > { %v269_v3 = vld [vmem:[%s256_s22] sm:$0xff]  ;;  %s579_s22 = scalar_lea.hbm %s800_s4, 64 }
  0x1d   : > { %289 = vrot.lane.b32.xlu0 %v287_v1, %s639_s5  ;;  %292 = vrot.lane.b32.xlu1 %v287_v1, %s640_s6 }
  0x1e   : > { %295 = vrot.lane.b32.xlu2 %v287_v1, %s641_s7 }
  0x25   : > { %303 = vrot.lane.b32.xlu0 %v301_v2, %s639_s5  ;;  %306 = vrot.lane.b32.xlu1 %v301_v2, %s640_s6 }
  0x26   : > { %315 = vrot.lane.b32.xlu2 %v269_v3, %s642_s24 }
  0x2d   : > { %309 = vrot.lane.b32.xlu0 %v301_v2, %s641_s7  ;;  %317 = vrot.lane.b32.xlu1 %v269_v3, %s643_s26 }
  0x70   : > { %v279_v4 = vpop.permute.xlu2 %278 }
  0x78   : > { %v296_v9 = vpop.permute.xlu2 %295 }
  0x80   : > { %v316_v17 = vpop.permute.xlu2 %315 }
  0x87   : > { %v273_v5 = vpop.permute.xlu0 %272  ;;  %v276_v6 = vpop.permute.xlu1 %275 }
  0x88   : > { %v282_v11 = vsel %vm281_vm0, %v270_v0, %v273_v5 }
  0x89   : > { %v284_v15 = vsel %vm283_vm1, %v282_v11, %v276_v6 }
  0x8a   : > { %v286_v18 = vsel %vm285_vm2, %v284_v15, %v279_v4 }
  0x8b   : > { %v319_v21 = vmul.f32 %v286_v18, %v269_v3 }
  0x8f   : > { %v290_v7 = vpop.permute.xlu0 %289  ;;  %v293_v8 = vpop.permute.xlu1 %292 }
  0x90   : > { %v298_v10 = vsel %vm281_vm0, %v287_v1, %v290_v7 }
  0x91   : > { %v299_v12 = vsel %vm283_vm1, %v298_v10, %v293_v8 }
  0x92   : > { %v300_v16 = vsel %vm285_vm2, %v299_v12, %v296_v9 }
  0x93   : > { %v320_v20 = vmul.f32 %v316_v17, %v300_v16 }
  0x95   : > { %v321_v26 = vadd.f32 %v320_v20, %v319_v21 }
  0x97   : > { %v304_v13 = vpop.permute.xlu0 %303  ;;  %v307_v14 = vpop.permute.xlu1 %306 }
  0x98   : > { %v312_v19 = vsel %vm281_vm0, %v301_v2, %v304_v13 }
  0x99   : > { %v313_v22 = vsel %vm283_vm1, %v312_v19, %v307_v14 }
  0x9f   : > { %v310_v23 = vpop.permute.xlu0 %309  ;;  %v318_v24 = vpop.permute.xlu1 %317 }
  0xa0   : > { %v314_v25 = vsel %vm285_vm2, %v313_v22, %v310_v23 }
  0xa1   : > { %v322_v27 = vmul.f32 %v318_v24, %v314_v25 }
  0xa3   : > { %v323_v28 = vadd.f32 %v322_v27, %v321_v26 }
  0xa5   : > { %336 = vrot.lane.b32.xlu1 %v323_v28, %s639_s5  ;;  %331 = vrot.lane.b32.xlu0 %v323_v28, %s640_s6  ;;  %324 = vst.msk [vmem:[%s249_s8] sm:$0xff] %vm281_vm0, %v323_v28  ;;  %s342_s5 = scalar_lea.sflag [#allocation3], %s247_s29  ;;  %s573_s6 = sshra.s32 %s358_s14, 4  ;;  %s574_s6 = int_to_ptr.hbm [resolvable:$true] %s573_s6 }
  0xa6   : > { %326 = vrot.lane.b32.xlu2 %v323_v28, %s641_s7  ;;  %s575_s7 = scalar_lea.hbm %s574_s6, 32  ;;  %p580_p1 = scmp.lt.s32.totalorder %s574_s6, %s800_s4 }
  0xa7   : > { %p576_p12 = scmp.ne.s32.totalorder %s574_s6, %s575_s7  ;;  %p581_p2 = scmp.lt.s32.totalorder %s579_s22, %s575_s7 }
  0xa9   : > { %p577_p13 = pnand %p576_p12, %p711_p4  ;;  %p582_p3 = por %p581_p2, %p580_p1 }
  0xab   : > { %p578_p0 = pneg %p577_p13 }
  0xad   : > { %p583_p5 = pnand %p582_p3, %p578_p0 }
 0x100   : > { %v327_v29 = vpop.permute.xlu2 %326 }
 0x101   : > { %488 = vst.msk [vmem:[%s249_s8 + $0x8] sm:$0xff] %vm281_vm0, %v327_v29 }
 0x117   : > { %v337_v30 = vpop.permute.xlu1 %336  ;;  %v332_v31 = vpop.permute.xlu0 %331 }
 0x118   : > { %490 = vst.msk [vmem:[%s249_s8 + $0x18] sm:$0xff] %vm281_vm0, %v337_v30 }
 0x119   : > { %489 = vst.msk [vmem:[%s249_s8 + $0x10] sm:$0xff] %vm281_vm0, %v332_v31 }
 0x11a   : > { %586 = shalt.err (!%p583_p5)
}
 0x11b   : > { %s644_s29 = smov 128   ;;  %s645_s30 = smov 8  }
 0x11c   : > { %497 = dma.vmem_to_hbm [thread:$0]  (%p711_p4), %s356_s13, 512, %s358_s14, %s342_s5, %s644_s29, %s644_s29, %s645_s30  }
 0x11d PF: > { %p503_p6 = scmp.ge.s32.totalorder %s637_s20, 2  ;;  %s372_s8 = sand.u32 1, %s617_s15  }
 0x11e   : > { %s373_s9 = scalar_lea.sflag [#allocation3], %s372_s8 }
 0x11f   : > { %p500_p7 = pnand %p503_p6, %p718_p8 }
 0x121   : > { %p501_p9 = pneg %p500_p7 }
 0x123   : > { %612 = dma.done.wait (%p501_p9), %s373_s9, 512  }
 0x124   : > { %614 = vsyncadd (%p501_p9), %s373_s9, 4294966784  ;;  %s17_s20 = sadd.s32 1, %s637_s20   ;;  %s803_s15 = smov %s621_s16 }
 0x125   : > { %p14_p10 = scmp.ge.s32.totalorder %s17_s20, 4   ;;  %s804_s16 = smov %s625_s17 }
 0x126   : > { %s805_s17 = smov %s724_s28  ;;  %s806_s18 = smov %s633_s19 }
 0x127   : > { %s807_s19 = smov %s809_s23  ;;  %16 = sbr.rel (!%p14_p10) target bundleno = 4 (0x4), region = 83 }
 0x12c   :  { %379 = vsyncpa [#allocation3], 1 }
 0x12d   :  { %381 = vsyncpa [#allocation3 + $0x1], 1 }

</bundles_post_ra>
